<compile_context>
chip_gen: v7x
topology: tpu7x:2x2x1
jax: 0.10.0
libtpu: 0.0.40
codegen_flags: <defaults>
</compile_context>

<pallas_src>
import jax
import jax.numpy as jnp
from jax import lax
from jax.experimental import pallas as pl
from jax.experimental.pallas import tpu as pltpu


def _round_up(n, m):
    return ((n + m - 1) // m) * m


def qvalue_kernel(xa_ref, w1_ref, b1_ref, w2_ref, b2_ref, w3_ref, b3_ref, out_ref):
    cdt = w1_ref.dtype                                     # MXU compute dtype (bf16 or f32)

    xa = xa_ref[...]                                       # [Bt, S+A] (already compute dtype)

    # fc1 + ReLU (f32 accumulate, f32 bias/ReLU)
    h1 = jnp.dot(xa, w1_ref[...], preferred_element_type=jnp.float32) + b1_ref[...]
    h1 = jnp.maximum(h1, 0.0)

    # fc2 + ReLU
    h2 = jnp.dot(h1.astype(cdt), w2_ref[...], preferred_element_type=jnp.float32) + b2_ref[...]
    h2 = jnp.maximum(h2, 0.0)

    # fc_out: contract H of w3[1,H] with H of h2[Bt,H] -> lane-dense [1, Bt] row
    # (avoids an N=1 matmul with a masked 1-lane output store).
    q = lax.dot_general(w3_ref[...], h2.astype(cdt),
                        dimension_numbers=(((1,), (1,)), ((), ())),
                        preferred_element_type=jnp.float32)          # [1, Bt]
    q = q + b3_ref[0]                                               # SMEM scalar bias
    out_ref[...] = q.reshape(out_ref.shape).astype(out_ref.dtype)


def prepare_params(raw_params, compute_dtype=jnp.bfloat16):
    """One-time weight prep (transpose / cast / reshape) hoisted out of the forward path."""
    w1, b1 = raw_params["w1"], raw_params["b1"]            # [H, S+A], [H]
    w2, b2 = raw_params["w2"], raw_params["b2"]            # [H, H],   [H]
    w3, b3 = raw_params["w3"], raw_params["b3"]            # [1, H],   [1]
    H = w1.shape[0]
    return {
        "w1": jnp.asarray(w1.T, compute_dtype),            # [S+A, H]
        "b1": jnp.asarray(b1, jnp.float32).reshape(1, H),
        "w2": jnp.asarray(w2.T, compute_dtype),            # [H, H]
        "b2": jnp.asarray(b2, jnp.float32).reshape(1, H),
        "w3": jnp.asarray(w3, compute_dtype),               # [1, H] (already a row)
        "b3": jnp.asarray(b3, jnp.float32).reshape(1),      # scalar -> SMEM
    }


def qvalue_net_continuous(x, a, p):
    """x: [B, state_dim], a: [B, action_dim] -> [B, 1]."""
    B, S = x.shape
    A = a.shape[1]
    SA, H = p["w1"].shape
    assert SA == S + A
    cdt = p["w1"].dtype
    out_dtype = x.dtype

    # One fused lane-packed input for fc1 (removes the K=action_dim extra matmul).
    xa = jnp.concatenate([x, a], axis=1).astype(cdt)        # [B, S+A]

    # Batch tiling: multiple of 8 sublanes, capped at 512 (multiple of 128/256 MXU dims).
    B_tile = min(512, _round_up(B, 8))
    B_pad = _round_up(B, B_tile)
    n_tiles = B_pad // B_tile
    if B_pad != B:
        xa = jnp.pad(xa, ((0, B_pad - B), (0, 0)))

    itm = jnp.dtype(cdt).itemsize
    out_itm = jnp.dtype(out_dtype).itemsize

    flops = int(2 * B_pad * (SA * H + H * H + H))
    bytes_accessed = int(B_pad * SA * itm                   # streamed activations
                         + (SA * H + H * H + H) * itm       # weights
                         + (2 * H + 1) * 4                  # f32 biases
                         + B_pad * out_itm)                 # output

    # VMEM budget: resident weights/biases + double-buffered in/out tiles (+ headroom),
    # clamped to 64 MiB so the same config stays legal on v7x's smaller VMEM.
    vmem_est = ((SA * H + H * H + H) * itm + (2 * H + 1) * 4
                + 2 * B_tile * SA * itm + 2 * B_tile * out_itm + (2 << 20))
    vmem_limit = int(min(max(vmem_est, 8 << 20), 64 << 20))

    out = pl.pallas_call(
        qvalue_kernel,
        out_shape=jax.ShapeDtypeStruct((n_tiles, 1, B_tile), out_dtype),
        grid=(n_tiles,),
        in_specs=[
            pl.BlockSpec((B_tile, SA), lambda i: (i, 0)),            # xa: streamed per tile
            pl.BlockSpec((SA, H), lambda i: (0, 0)),                 # w1: VMEM-resident
            pl.BlockSpec((1, H), lambda i: (0, 0)),                  # b1 (f32)
            pl.BlockSpec((H, H), lambda i: (0, 0)),                  # w2: VMEM-resident
            pl.BlockSpec((1, H), lambda i: (0, 0)),                  # b2 (f32)
            pl.BlockSpec((1, H), lambda i: (0, 0)),                  # w3 row
            pl.BlockSpec(memory_space=pltpu.MemorySpace.SMEM),       # b3 scalar
        ],
        out_specs=pl.BlockSpec((1, 1, B_tile), lambda i: (i, 0, 0)),  # lane-dense rows
        compiler_params=pltpu.CompilerParams(
            dimension_semantics=("parallel",),
            vmem_limit_bytes=vmem_limit,
        ),
        cost_estimate=pl.CostEstimate(flops=flops, transcendentals=0,
                                      bytes_accessed=bytes_accessed),
    )(xa, p["w1"], p["b1"], p["w2"], p["b2"], p["w3"], p["b3"])

    return out.reshape(B_pad, 1)[:B]


def init_params(key, state_dim, hidden_dim, action_dim, dtype=jnp.float32):
    """Deterministic init mimicking nn.Linear's default uniform(-1/sqrt(in), 1/sqrt(in))."""
    ks = jax.random.split(key, 6)

    def lin(kw, kb, fan_in, fan_out):
        bound = 1.0 / jnp.sqrt(fan_in)
        w = jax.random.uniform(kw, (fan_out, fan_in), dtype, -bound, bound)
        b = jax.random.uniform(kb, (fan_out,), dtype, -bound, bound)
        return w, b

    w1, b1 = lin(ks[0], ks[1], state_dim + action_dim, hidden_dim)
    w2, b2 = lin(ks[2], ks[3], hidden_dim, hidden_dim)
    w3, b3 = lin(ks[4], ks[5], hidden_dim, 1)
    return {"w1": w1, "b1": b1, "w2": w2, "b2": b2, "w3": w3, "b3": b3}


def reference_forward(x, a, p):
    cat = jnp.concatenate([x, a], axis=1)
    h = jax.nn.relu(cat @ p["w1"].T + p["b1"])
    h = jax.nn.relu(h @ p["w2"].T + p["b2"])
    return h @ p["w3"].T + p["b3"]


if __name__ == "__main__":
    key = jax.random.PRNGKey(0)
    state_dim, hidden_dim, action_dim = 16, 32, 4
    batch = 2

    k_params, k_x, k_a = jax.random.split(key, 3)
    raw_params = init_params(k_params, state_dim, hidden_dim, action_dim)
    x = jax.random.normal(k_x, (batch, state_dim), jnp.float32)
    a = jax.random.normal(k_a, (batch, action_dim), jnp.float32)

    ref = reference_forward(x, a, raw_params)

    fwd = jax.jit(qvalue_net_continuous)

    # Exact-precision path (f32 weights): tight check against the reference.
    p_f32 = prepare_params(raw_params, compute_dtype=jnp.float32)
    out_f32 = jax.block_until_ready(fwd(x, a, p_f32))
    assert out_f32.shape == (batch, 1)
    assert jnp.allclose(out_f32, ref, atol=1e-4, rtol=1e-4)

    # Production path (bf16 MXU operands, f32 accumulation): loose check.
    p_bf16 = prepare_params(raw_params, compute_dtype=jnp.bfloat16)
    out_bf16 = jax.block_until_ready(fwd(x, a, p_bf16))
    assert out_bf16.shape == (batch, 1)
    assert jnp.allclose(out_bf16, ref, atol=5e-2, rtol=5e-2)

    print("KERNEL_OK")
</pallas_src>

<mosaic_0001>
module attributes {stable_mosaic.version = 11 : i64} {
  func.func @qvalue_kernel(%arg0: i32, %arg1: memref<8x20xf32, #tpu.memory_space<vmem>>, %arg2: memref<20x32xf32, #tpu.memory_space<vmem>>, %arg3: memref<1x32xf32, #tpu.memory_space<vmem>>, %arg4: memref<32x32xf32, #tpu.memory_space<vmem>>, %arg5: memref<1x32xf32, #tpu.memory_space<vmem>>, %arg6: memref<1x32xf32, #tpu.memory_space<vmem>>, %arg7: memref<1xf32, #tpu.memory_space<smem>>, %arg8: memref<1x1x8xf32, #tpu.memory_space<vmem>>) attributes {dimension_semantics = [#tpu.dimension_semantics<parallel>], iteration_bounds = array<i64: 1>, scalar_prefetch = 0 : i64, scratch_operands = 0 : i64, tpu.core_type = #tpu.core_type<tc>, window_params = [{transform_indices = @transform_0, window_bounds = array<i64: 8, 20>}, {pipeline_mode = #tpu.pipeline_mode<synchronous>, transform_indices = @transform_1, window_bounds = array<i64: 20, 32>}, {pipeline_mode = #tpu.pipeline_mode<synchronous>, transform_indices = @transform_2, window_bounds = array<i64: 1, 32>}, {pipeline_mode = #tpu.pipeline_mode<synchronous>, transform_indices = @transform_3, window_bounds = array<i64: 32, 32>}, {pipeline_mode = #tpu.pipeline_mode<synchronous>, transform_indices = @transform_4, window_bounds = array<i64: 1, 32>}, {pipeline_mode = #tpu.pipeline_mode<synchronous>, transform_indices = @transform_5, window_bounds = array<i64: 1, 32>}, {transform_indices = @transform_6, window_bounds = array<i64: 1>}, {transform_indices = @transform_7, window_bounds = array<i64: 1, 1, 8>}]} {
    %c0 = arith.constant 0 : index
    %c0_0 = arith.constant 0 : index
    %0 = vector.load %arg1[%c0, %c0_0] : memref<8x20xf32, #tpu.memory_space<vmem>>, vector<8x20xf32>
    %c0_1 = arith.constant 0 : index
    %c0_2 = arith.constant 0 : index
    %1 = vector.load %arg2[%c0_1, %c0_2] : memref<20x32xf32, #tpu.memory_space<vmem>>, vector<20x32xf32>
    %cst = arith.constant dense<0.000000e+00> : vector<8x32xf32>
    %2 = tpu.matmul %0, %1, %cst {dimension_numbers = #tpu.dot_dimension_numbers<[1], [0], [0], [1], [0, 0, 1, 1], [], []>} : vector<8x20xf32>, vector<20x32xf32>, vector<8x32xf32> -> vector<8x32xf32>
    %c0_3 = arith.constant 0 : index
    %c0_4 = arith.constant 0 : index
    %3 = vector.load %arg3[%c0_3, %c0_4] : memref<1x32xf32, #tpu.memory_space<vmem>>, vector<1x32xf32>
    %4 = vector.broadcast %3 : vector<1x32xf32> to vector<8x32xf32>
    %5 = arith.addf %2, %4 : vector<8x32xf32>
    %cst_5 = arith.constant 0.000000e+00 : f32
    %6 = vector.broadcast %cst_5 : f32 to vector<8x32xf32>
    %7 = arith.maximumf %5, %6 : vector<8x32xf32>
    %c0_6 = arith.constant 0 : index
    %c0_7 = arith.constant 0 : index
    %8 = vector.load %arg4[%c0_6, %c0_7] : memref<32x32xf32, #tpu.memory_space<vmem>>, vector<32x32xf32>
    %cst_8 = arith.constant dense<0.000000e+00> : vector<8x32xf32>
    %9 = tpu.matmul %7, %8, %cst_8 {dimension_numbers = #tpu.dot_dimension_numbers<[1], [0], [0], [1], [0, 0, 1, 1], [], []>} : vector<8x32xf32>, vector<32x32xf32>, vector<8x32xf32> -> vector<8x32xf32>
    %c0_9 = arith.constant 0 : index
    %c0_10 = arith.constant 0 : index
    %10 = vector.load %arg5[%c0_9, %c0_10] : memref<1x32xf32, #tpu.memory_space<vmem>>, vector<1x32xf32>
    %11 = vector.broadcast %10 : vector<1x32xf32> to vector<8x32xf32>
    %12 = arith.addf %9, %11 : vector<8x32xf32>
    %cst_11 = arith.constant 0.000000e+00 : f32
    %13 = vector.broadcast %cst_11 : f32 to vector<8x32xf32>
    %14 = arith.maximumf %12, %13 : vector<8x32xf32>
    %c0_12 = arith.constant 0 : index
    %c0_13 = arith.constant 0 : index
    %15 = vector.load %arg6[%c0_12, %c0_13] : memref<1x32xf32, #tpu.memory_space<vmem>>, vector<1x32xf32>
    %cst_14 = arith.constant dense<0.000000e+00> : vector<1x8xf32>
    %16 = tpu.matmul %15, %14, %cst_14 {dimension_numbers = #tpu.dot_dimension_numbers<[1], [1], [0], [0], [0, 0, 1, 0], [], []>} : vector<1x32xf32>, vector<8x32xf32>, vector<1x8xf32> -> vector<1x8xf32>
    %c0_15 = arith.constant 0 : index
    %17 = memref.load %arg7[%c0_15] : memref<1xf32, #tpu.memory_space<smem>>
    %18 = vector.broadcast %17 : f32 to vector<1x8xf32>
    %19 = arith.addf %16, %18 : vector<1x8xf32>
    %20 = vector.shape_cast %19 : vector<1x8xf32> to vector<1x1x8xf32>
    %c0_16 = arith.constant 0 : index
    %c0_17 = arith.constant 0 : index
    %c0_18 = arith.constant 0 : index
    %21 = vector.load %arg8[%c0_16, %c0_17, %c0_18] : memref<1x1x8xf32, #tpu.memory_space<vmem>>, vector<1x1x8xf32>
    tpu.vector_store %arg8[%c0_16, %c0_17, %c0_18], %20 {strides = array<i32>} : memref<1x1x8xf32, #tpu.memory_space<vmem>>, vector<1x1x8xf32>,
    return
  }
  func.func @transform_0(%arg0: i32) -> (i32, i32) {
    %c0_i32 = arith.constant 0 : i32
    %c0_i32_0 = arith.constant 0 : i32
    return %arg0, %c0_i32 : i32, i32
  }
  func.func @transform_1(%arg0: i32) -> (i32, i32) {
    %c0_i32 = arith.constant 0 : i32
    %c0_i32_0 = arith.constant 0 : i32
    %c0_i32_1 = arith.constant 0 : i32
    return %c0_i32, %c0_i32_0 : i32, i32
  }
  func.func @transform_2(%arg0: i32) -> (i32, i32) {
    %c0_i32 = arith.constant 0 : i32
    %c0_i32_0 = arith.constant 0 : i32
    %c0_i32_1 = arith.constant 0 : i32
    return %c0_i32, %c0_i32_0 : i32, i32
  }
  func.func @transform_3(%arg0: i32) -> (i32, i32) {
    %c0_i32 = arith.constant 0 : i32
    %c0_i32_0 = arith.constant 0 : i32
    %c0_i32_1 = arith.constant 0 : i32
    return %c0_i32, %c0_i32_0 : i32, i32
  }
  func.func @transform_4(%arg0: i32) -> (i32, i32) {
    %c0_i32 = arith.constant 0 : i32
    %c0_i32_0 = arith.constant 0 : i32
    %c0_i32_1 = arith.constant 0 : i32
    return %c0_i32, %c0_i32_0 : i32, i32
  }
  func.func @transform_5(%arg0: i32) -> (i32, i32) {
    %c0_i32 = arith.constant 0 : i32
    %c0_i32_0 = arith.constant 0 : i32
    %c0_i32_1 = arith.constant 0 : i32
    return %c0_i32, %c0_i32_0 : i32, i32
  }
  func.func @transform_6(%arg0: i32) -> i32 {
    %c0_i32 = arith.constant 0 : i32
    %c0_i32_0 = arith.constant 0 : i32
    return %c0_i32 : i32
  }
  func.func @transform_7(%arg0: i32) -> (i32, i32, i32) {
    %c0_i32 = arith.constant 0 : i32
    %c0_i32_0 = arith.constant 0 : i32
    %c0_i32_1 = arith.constant 0 : i32
    return %arg0, %c0_i32, %c0_i32_0 : i32, i32, i32
  }
}

</mosaic_0001>

<bundles_post_ra>
// kernel: qvalue_net_continuous.1
= control target key start
LH: loop header
LB: loop body
LE: loop exit
PB: predicated region body
PF: predicated region fallthrough
CT: control target
= control target key end

     0   :  { %13 = vsyncpa [#allocation4], 0  ;;  %s385_s24 = smov [#allocation3]   ;;  %s476_s0 = inlined_call_operand.vmem [shape: f32[8,20], index: 0, kind: input, shape index: {}]   ;;  %s477_s1 = inlined_call_operand.hbm [shape: f32[20,32], index: 1, kind: input, shape index: {}]   ;;  %s478_s2 = inlined_call_operand.vmem [shape: f32[1,32], index: 2, kind: input, shape index: {}]   ;;  %s479_s3 = inlined_call_operand.vmem [shape: f32[32,32], index: 3, kind: input, shape index: {}]   ;;  %s480_s4 = inlined_call_operand.vmem [shape: f32[1,32], index: 4, kind: input, shape index: {}]   ;;  %s481_s5 = inlined_call_operand.vmem [shape: f32[1,32], index: 5, kind: input, shape index: {}]   ;;  %s482_s6 = inlined_call_operand.<no memory space> [shape: f32[1], index: 6, kind: input, shape index: {}]   ;;  %s483_s7 = inlined_call_operand.vmem [shape: f32[1,1,8], index: 7, kind: output, shape index: {}]  }
   0x1   :  { %s21_s25 = sshll.u32 %s385_s24, 4  ;;  %s361_s28 = scalar_lea.hbm %s477_s1, 384  ;;  %s22_s25 = int_to_ptr.vmem [resolvable:$true] %s21_s25 }
   0x2   :  { %p362_p0 = scmp.ne.s32.totalorder %s477_s1, %s361_s28  ;;  %p365_p1 = scmp.lt.u32.totalorder %s361_s28, %s477_s1 }
   0x4   :  { %p367_p2 = pnand %p365_p1, %p362_p0 }
   0x6   :  { %370 = shalt.err (!%p367_p2)
}
   0x7   :  { %s371_s10 = scalar_lea.vmem %s22_s25, 384  ;;  %p376_p4 = scmp.lt.s32.totalorder %s22_s25, %s22_s25 }
   0x8   :  { %p372_p3 = scmp.ne.s32.totalorder %s22_s25, %s371_s10  ;;  %p377_p5 = scmp.lt.s32.totalorder %s371_s10, %s371_s10 }
   0xa   :  { %p378_p6 = por %p377_p5, %p376_p4 }
   0xc   :  { %p379_p7 = pnand %p378_p6, %p372_p3 }
   0xe   :  { %382 = shalt.err (!%p379_p7)
}
   0xf   :  { %s386_s11 = smov 128   ;;  %s387_s12 = smov 8  }
  0x10   :  { %27 = dma.hbm_to_vmem [thread:$0]  %s477_s1, 384, %s22_s25, [#allocation4], %s386_s11, %s386_s11, %s387_s12  }
  0x11   :  { %383 = dma.done.wait [#allocation4], 384  }
  0x12   :  { %384 = vsyncadd [#allocation4], 4294966912  ;;  %v388_v0 = vmov 0.0|0.0   ;;  %vm389_vm0 = vmmov 0   ;;  %v390_v1 = vmov 0.0   ;;  %v42_v2 = vld [vmem:[#allocation3] sm:$0xff]  ;;  %v219_v24 = vstv %s482_s6 }
  0x13   :  { %346 = vmatprep.subr.bf16.mxu0 %v388_v0  ;;  %327 = vmatprep.mubr.msk.f32.mxu0 %vm389_vm0, %v390_v1  ;;  %v43_v3 = vld [vmem:[#allocation3 + $0x8] sm:$0xff]  ;;  %v131_v5 = vld [vmem:[%s479_s3] sm:$0xff]  ;;  %v44_v8 = vld [vmem:[#allocation3 + $0x10] sm:$0xf]  ;;  %vm56_vm1 = vcmask 1043456   ;;  %vm52_vm2 = vcmask 162816  }
  0x14   :  { %349 = vmatprep.subr.bf16.mxu1 %v388_v0  ;;  %338 = vmatprep.mubr.msk.f32.mxu1 %vm389_vm0, %v390_v1  ;;  %v347_v4 = vpack.c.bf16 %v43_v3, %v42_v2  ;;  %v132_v6 = vld [vmem:[%s479_s3 + $0x8] sm:$0xff]  ;;  %v41_v9 = vld [vmem:[%s476_s0] sm:$0xff]  ;;  %v133_v10 = vld [vmem:[%s479_s3 + $0x10] sm:$0xff]  ;;  %vm142_vm3 = vcmask 261120   ;;  %vm296_vm4 = vcmask 57344  }
  0x15   :  { %v350_v7 = vpack.c.bf16 %v132_v6, %v131_v5  ;;  %v134_v11 = vld [vmem:[%s479_s3 + $0x18] sm:$0xff]  ;;  %v303_v13 = vld [vmem:[%s478_s2] ss:$0 sm:$0xff] }
  0x16   :  { %348 = vmatpush3.bf16.msra.mxu0 %v347_v4  ;;  %v353_v12 = vpack.c.bf16 %v134_v11, %v133_v10  ;;  %v306_v18 = vld [vmem:[%s480_s4] ss:$0 sm:$0xff] }
  0x17   :  { %325 = vmatprep.subr.mxu0 %v390_v1  ;;  %351 = vmatpush3.bf16.msra.mxu1 %v350_v7  ;;  %v217_v23 = vld [vmem:[%s481_s5] sm:$0x1] }
  0x18   :  { %352 = vmatprep.subr.bf16.mxu1 %v388_v0 }
  0x1a   :  { %326 = vmatpush3.msk.msra.mxu0 %vm56_vm1, %v44_v8 }
  0x1b   :  { %328 = vmatmul.mubr.msk.f32.vlgmr.msra.gmra.mrb[0].mxu0 %vm52_vm2, %v41_v9  ;;  %341 = vmatprep.subr.mxu0 %v390_v1 }
  0x1c   :  { %343 = vmatprep.mubr.msk.f32.mxu0 %vm389_vm0, %v390_v1  ;;  %354 = vmatpush3.bf16.msra.mxu1 %v353_v12 }
  0xee   :  { %v126_v14 = vpop.f32.mrb[0].mxu0 }
  0xef   :  { %v127_v15 = vadd.f32 %v303_v13, %v126_v14  ;;  %v329_v16 = vpop.f32.mrb[1].mxu0 }
  0xf1   :  { %v130_v17 = vmax.f32 %v127_v15, 0.0 }
  0xf3   :  { %339 = vmatmul.mubr.msk.f32.vlgmr.msra.gmra.mrb[0].mxu1 %vm142_vm3, %v130_v17 }
 0x1c6   :  { %v212_v19 = vpop.f32.mrb[0].mxu1 }
 0x1c7   :  { %v213_v20 = vadd.f32 %v306_v18, %v212_v19  ;;  %v340_v21 = vpop.f32.mrb[1].mxu1 }
 0x1c9   :  { %v216_v22 = vmax.f32 %v213_v20, 0.0 }
 0x1cb   :  { %342 = vmatpush3.xpose.msk.msra.mxu0 %vm142_vm3, %v216_v22 }
 0x1ce   :  { %344 = vmatmul.mubr.msk.f32.vlgmr.msra.gmra.mrb[2].mxu0 %vm142_vm3, %v217_v23 }
 0x2a1   :  { %v292_v25 = vpop.f32.mrb[2].mxu0 }
 0x2a2   :  { %v293_v26 = vadd.f32 %v292_v25, %v219_v24  ;;  %v345_v27 = vpop.f32.mrb[3].mxu0 }
 0x2a4   :  { %297 = vst.msk [vmem:[%s483_s7] sm:$0x1] %vm296_vm4, %v293_v26 }
 0x2a5   :  { %302 = vsyncpa [#allocation4], 1 }

</bundles_post_ra>
